<compile_context>
chip_gen: v7x
topology: tpu7x:2x2x1
jax: 0.10.0
libtpu: 0.0.40
codegen_flags: <defaults>
</compile_context>

<pallas_src>
import jax
import jax.numpy as jnp
from jax.experimental import pallas as pl
from jax.experimental.pallas import tpu as pltpu


# -----------------------------------------------------------------------------
# One-time parameter preparation (hoisted out of the step path).
# -----------------------------------------------------------------------------
def prepare_params(w_i2h, b_i2h, w_i2o, b_i2o, dtype=jnp.float32):
    """Fuse + transpose the PyTorch-layout weights once.

    w_i2h: (H, I+H), w_i2o: (O, I+H)  (PyTorch nn.Linear layout)
    Returns:
      w_fused: (I+H, H+O)  column layout: [:H] -> i2h, [H:] -> i2o
      b      : (1, H+O)    fused bias (kept f32)
    """
    H = w_i2h.shape[0]
    O = w_i2o.shape[0]
    w_fused = jnp.concatenate([w_i2h.T, w_i2o.T], axis=1).astype(dtype)  # (I+H, H+O)
    b = jnp.concatenate([b_i2h, b_i2o]).reshape(1, H + O).astype(jnp.float32)
    return w_fused, b


# -----------------------------------------------------------------------------
# Fused recurrence kernel: Tc RNN-cell steps per grid iteration.
# -----------------------------------------------------------------------------
def _rnn_scan_kernel(x_ref, h0_ref, w_ref, b_ref, out_ref, hlast_ref):
    Tc = x_ref.shape[0]
    H = hlast_ref.shape[-1]

    # First chunk: seed the cross-chunk hidden carry from h0.
    @pl.when(pl.program_id(0) == 0)
    def _():
        hlast_ref[...] = h0_ref[...]

    w = w_ref[...]            # resident fused weight (I+H, H+O)
    b = b_ref[...]            # resident fused bias   (1,   H+O)

    def step(ts, h):
        # Single MXU pass: [x_t, h] @ W_fused + b, concat done in VMEM/vregs.
        combined = jnp.concatenate([x_ref[ts], h], axis=-1)        # (B, I+H)
        acc = jnp.dot(combined.astype(w.dtype), w,
                      preferred_element_type=jnp.float32) + b      # (B, H+O)

        new_h = acc[:, :H]                                         # i2h columns
        logits = acc[:, H:]                                        # i2o columns

        # log-softmax in f32 (EUP ops).
        m = jnp.max(logits, axis=-1, keepdims=True)
        shifted = logits - m
        lse = jnp.log(jnp.sum(jnp.exp(shifted), axis=-1, keepdims=True))
        out_ref[ts] = (shifted - lse).astype(out_ref.dtype)
        return new_h

    # Hidden carried in vregs across the unrolled steps; written once per chunk.
    hlast_ref[...] = jax.lax.fori_loop(0, Tc, step, hlast_ref[...], unroll=True)


def rnn_scan(xs, h0, w_fused, b, *, t_chunk=None):
    """Apply the RNN cell over xs[0..T-1] with the recurrence fused in-kernel.

    xs: (T, B, I), h0: (B, H) -> (outs: (T, B, O), h_T: (B, H))
    Semantically identical to calling the module forward T times, feeding the
    hidden state back.
    """
    T, B, I = xs.shape
    H = h0.shape[1]
    N = w_fused.shape[1]
    O = N - H
    if t_chunk is None or t_chunk > T:
        t_chunk = T
    assert T % t_chunk == 0, "t_chunk must divide T"
    n_chunks = T // t_chunk

    return pl.pallas_call(
        _rnn_scan_kernel,
        out_shape=(
            jax.ShapeDtypeStruct((T, B, O), jnp.float32),
            jax.ShapeDtypeStruct((B, H), jnp.float32),
        ),
        grid=(n_chunks,),
        in_specs=[
            pl.BlockSpec((t_chunk, B, I), lambda c: (c, 0, 0)),   # input chunk
            pl.BlockSpec((B, H), lambda c: (0, 0)),               # h0 (resident)
            pl.BlockSpec((I + H, N), lambda c: (0, 0)),           # W_fused (resident)
            pl.BlockSpec((1, N), lambda c: (0, 0)),               # bias (resident)
        ],
        out_specs=(
            pl.BlockSpec((t_chunk, B, O), lambda c: (c, 0, 0)),   # output chunk
            pl.BlockSpec((B, H), lambda c: (0, 0)),               # final hidden
        ),
        compiler_params=pltpu.CompilerParams(
            dimension_semantics=("arbitrary",)),                  # recurrent axis
    )(xs, h0, w_fused, b)


def rnn_cell(x, hidden, w_fused, b):
    """Pallas equivalent of RNN.forward(input, hidden) -> (output, hidden)."""
    outs, h = rnn_scan(x[None], hidden, w_fused, b)
    return outs[0], h


# -----------------------------------------------------------------------------
# Reference + init helpers.
# -----------------------------------------------------------------------------
def _init_linear(key, out_features, in_features):
    kw, kb = jax.random.split(key)
    bound = 1.0 / jnp.sqrt(jnp.float32(in_features))
    w = jax.random.uniform(kw, (out_features, in_features), jnp.float32,
                           -bound, bound)
    b = jax.random.uniform(kb, (out_features,), jnp.float32, -bound, bound)
    return w, b


def _reference_step(x, h, w_i2h, b_i2h, w_i2o, b_i2o):
    combined = jnp.concatenate([x, h], axis=1)
    hp = jax.lax.Precision.HIGHEST
    new_h = jnp.dot(combined, w_i2h.T, precision=hp) + b_i2h
    logits = jnp.dot(combined, w_i2o.T, precision=hp) + b_i2o
    return jax.nn.log_softmax(logits, axis=1), new_h


if __name__ == "__main__":
    # B=8 fills all f32 sublanes; input/hidden/output sizes match the module.
    B, I, H, O, T = 8, 16, 32, 8, 8

    key = jax.random.PRNGKey(0)
    k_x, k_xs, k_l1, k_l2 = jax.random.split(key, 4)

    x = jax.random.normal(k_x, (B, I), jnp.float32)
    xs = jax.random.normal(k_xs, (T, B, I), jnp.float32)
    h0 = jnp.zeros((B, H), jnp.float32)          # initHidden, broadcast to B

    w_i2h, b_i2h = _init_linear(k_l1, H, I + H)
    w_i2o, b_i2o = _init_linear(k_l2, O, I + H)

    # One-time glue, hoisted out of the step path.
    w_fused, b = prepare_params(w_i2h, b_i2h, w_i2o, b_i2o)

    # --- single forward step (module semantics) ------------------------------
    out, new_h = rnn_cell(x, h0, w_fused, b)
    out, new_h = jax.block_until_ready(out), jax.block_until_ready(new_h)
    ref_out, ref_h = _reference_step(x, h0, w_i2h, b_i2h, w_i2o, b_i2o)
    assert jnp.allclose(out, ref_out, atol=1e-4, rtol=1e-4)
    assert jnp.allclose(new_h, ref_h, atol=1e-4, rtol=1e-4)

    # --- fused T-step recurrence in one launch --------------------------------
    outs, h_last = rnn_scan(xs, h0, w_fused, b)
    outs, h_last = jax.block_until_ready(outs), jax.block_until_ready(h_last)
    h_r = h0
    for t in range(T):
        o_r, h_r = _reference_step(xs[t], h_r, w_i2h, b_i2h, w_i2o, b_i2o)
        assert jnp.allclose(outs[t], o_r, atol=1e-4, rtol=1e-4)
    assert jnp.allclose(h_last, h_r, atol=1e-4, rtol=1e-4)

    print("KERNEL_OK")
</pallas_src>

<mosaic_0001>
module attributes {stable_mosaic.version = 11 : i64} {
  func.func @_rnn_scan_kernel(%arg0: i32, %arg1: memref<1x8x16xf32, #tpu.memory_space<vmem>>, %arg2: memref<8x32xf32, #tpu.memory_space<vmem>>, %arg3: memref<48x40xf32, #tpu.memory_space<vmem>>, %arg4: memref<1x40xf32, #tpu.memory_space<vmem>>, %arg5: memref<1x8x8xf32, #tpu.memory_space<vmem>>, %arg6: memref<8x32xf32, #tpu.memory_space<vmem>>) attributes {dimension_semantics = [#tpu.dimension_semantics<arbitrary>], iteration_bounds = array<i64: 1>, scalar_prefetch = 0 : i64, scratch_operands = 0 : i64, tpu.core_type = #tpu.core_type<tc>, window_params = [{transform_indices = @transform_0, window_bounds = array<i64: 1, 8, 16>}, {pipeline_mode = #tpu.pipeline_mode<synchronous>, transform_indices = @transform_1, window_bounds = array<i64: 8, 32>}, {pipeline_mode = #tpu.pipeline_mode<synchronous>, transform_indices = @transform_2, window_bounds = array<i64: 48, 40>}, {pipeline_mode = #tpu.pipeline_mode<synchronous>, transform_indices = @transform_3, window_bounds = array<i64: 1, 40>}, {transform_indices = @transform_4, window_bounds = array<i64: 1, 8, 8>}, {pipeline_mode = #tpu.pipeline_mode<synchronous>, transform_indices = @transform_5, window_bounds = array<i64: 8, 32>}]} {
    %c0_i32 = arith.constant 0 : i32
    %0 = arith.cmpi eq, %arg0, %c0_i32 : i32
    %1 = arith.extui %0 : i1 to i32
    %c0_i32_0 = arith.constant 0 : i32
    %2 = arith.cmpi ne, %1, %c0_i32_0 : i32
    scf.if %2 {
      %c0_15 = arith.constant 0 : index
      %c0_16 = arith.constant 0 : index
      %30 = vector.load %arg2[%c0_15, %c0_16] : memref<8x32xf32, #tpu.memory_space<vmem>>, vector<8x32xf32>
      %c0_17 = arith.constant 0 : index
      %c0_18 = arith.constant 0 : index
      %31 = vector.load %arg6[%c0_17, %c0_18] : memref<8x32xf32, #tpu.memory_space<vmem>>, vector<8x32xf32>
      tpu.vector_store %arg6[%c0_17, %c0_18], %30 {strides = array<i32>} : memref<8x32xf32, #tpu.memory_space<vmem>>, vector<8x32xf32>,
    } else {
    }
    %c0 = arith.constant 0 : index
    %c0_1 = arith.constant 0 : index
    %3 = vector.load %arg3[%c0, %c0_1] : memref<48x40xf32, #tpu.memory_space<vmem>>, vector<48x40xf32>
    %c0_2 = arith.constant 0 : index
    %c0_3 = arith.constant 0 : index
    %4 = vector.load %arg4[%c0_2, %c0_3] : memref<1x40xf32, #tpu.memory_space<vmem>>, vector<1x40xf32>
    %c0_4 = arith.constant 0 : index
    %c0_5 = arith.constant 0 : index
    %5 = vector.load %arg6[%c0_4, %c0_5] : memref<8x32xf32, #tpu.memory_space<vmem>>, vector<8x32xf32>
    %c0_i32_6 = arith.constant 0 : i32
    %6 = arith.index_cast %c0_i32_6 : i32 to index
    %c0_7 = arith.constant 0 : index
    %c0_8 = arith.constant 0 : index
    %7 = vector.load %arg1[%6, %c0_7, %c0_8] : memref<1x8x16xf32, #tpu.memory_space<vmem>>, vector<1x8x16xf32>
    %8 = vector.shape_cast %7 : vector<1x8x16xf32> to vector<8x16xf32>
    %9 = tpu.concatenate %8, %5 in 1 : vector<8x16xf32>, vector<8x32xf32> -> vector<8x48xf32>
    %cst = arith.constant dense<0.000000e+00> : vector<8x40xf32>
    %10 = tpu.matmul %9, %3, %cst {dimension_numbers = #tpu.dot_dimension_numbers<[1], [0], [0], [1], [0, 0, 1, 1], [], []>} : vector<8x48xf32>, vector<48x40xf32>, vector<8x40xf32> -> vector<8x40xf32>
    %11 = vector.broadcast %4 : vector<1x40xf32> to vector<8x40xf32>
    %12 = arith.addf %10, %11 : vector<8x40xf32>
    %13 = vector.extract_strided_slice %12 {offsets = [0, 0], sizes = [8, 32], strides = [1, 1]} : vector<8x40xf32> to vector<8x32xf32>
    %14 = vector.extract_strided_slice %12 {offsets = [0, 32], sizes = [8, 8], strides = [1, 1]} : vector<8x40xf32> to vector<8x8xf32>
    %cst_9 = arith.constant dense<0xFF800000> : vector<8xf32>
    %15 = vector.multi_reduction <maximumf>, %14, %cst_9 [1] : vector<8x8xf32> to vector<8xf32>
    %16 = vector.shape_cast %15 : vector<8xf32> to vector<8x1xf32>
    %17 = vector.broadcast %16 : vector<8x1xf32> to vector<8x8xf32>
    %18 = arith.subf %14, %17 : vector<8x8xf32>
    %19 = math.exp %18 : vector<8x8xf32>
    %cst_10 = arith.constant dense<0.000000e+00> : vector<8xf32>
    %20 = vector.multi_reduction <add>, %19, %cst_10 [1] : vector<8x8xf32> to vector<8xf32>
    %21 = vector.shape_cast %20 : vector<8xf32> to vector<8x1xf32>
    %22 = math.log %21 : vector<8x1xf32>
    %23 = vector.broadcast %22 : vector<8x1xf32> to vector<8x8xf32>
    %24 = arith.subf %18, %23 : vector<8x8xf32>
    %25 = arith.index_cast %c0_i32_6 : i32 to index
    %c0_11 = arith.constant 0 : index
    %c0_12 = arith.constant 0 : index
    %26 = vector.load %arg5[%25, %c0_11, %c0_12] : memref<1x8x8xf32, #tpu.memory_space<vmem>>, vector<1x8x8xf32>
    %27 = vector.shape_cast %26 : vector<1x8x8xf32> to vector<8x8xf32>
    %28 = vector.shape_cast %24 : vector<8x8xf32> to vector<1x8x8xf32>
    tpu.vector_store %arg5[%25, %c0_11, %c0_12], %28 {strides = array<i32>} : memref<1x8x8xf32, #tpu.memory_space<vmem>>, vector<1x8x8xf32>,
    %c1_i32 = arith.constant 1 : i32
    %c0_13 = arith.constant 0 : index
    %c0_14 = arith.constant 0 : index
    %29 = vector.load %arg6[%c0_13, %c0_14] : memref<8x32xf32, #tpu.memory_space<vmem>>, vector<8x32xf32>
    tpu.vector_store %arg6[%c0_13, %c0_14], %13 {strides = array<i32>} : memref<8x32xf32, #tpu.memory_space<vmem>>, vector<8x32xf32>,
    return
  }
  func.func @transform_0(%arg0: i32) -> (i32, i32, i32) {
    %c0_i32 = arith.constant 0 : i32
    %c0_i32_0 = arith.constant 0 : i32
    %c0_i32_1 = arith.constant 0 : i32
    return %arg0, %c0_i32, %c0_i32_0 : i32, i32, i32
  }
  func.func @transform_1(%arg0: i32) -> (i32, i32) {
    %c0_i32 = arith.constant 0 : i32
    %c0_i32_0 = arith.constant 0 : i32
    %c0_i32_1 = arith.constant 0 : i32
    return %c0_i32, %c0_i32_0 : i32, i32
  }
  func.func @transform_2(%arg0: i32) -> (i32, i32) {
    %c0_i32 = arith.constant 0 : i32
    %c0_i32_0 = arith.constant 0 : i32
    %c0_i32_1 = arith.constant 0 : i32
    return %c0_i32, %c0_i32_0 : i32, i32
  }
  func.func @transform_3(%arg0: i32) -> (i32, i32) {
    %c0_i32 = arith.constant 0 : i32
    %c0_i32_0 = arith.constant 0 : i32
    %c0_i32_1 = arith.constant 0 : i32
    return %c0_i32, %c0_i32_0 : i32, i32
  }
  func.func @transform_4(%arg0: i32) -> (i32, i32, i32) {
    %c0_i32 = arith.constant 0 : i32
    %c0_i32_0 = arith.constant 0 : i32
    %c0_i32_1 = arith.constant 0 : i32
    return %arg0, %c0_i32, %c0_i32_0 : i32, i32, i32
  }
  func.func @transform_5(%arg0: i32) -> (i32, i32) {
    %c0_i32 = arith.constant 0 : i32
    %c0_i32_0 = arith.constant 0 : i32
    %c0_i32_1 = arith.constant 0 : i32
    return %c0_i32, %c0_i32_0 : i32, i32
  }
}

</mosaic_0001>

<bundles_post_ra>
// kernel: tpu_custom_call.1
= control target key start
LH: loop header
LB: loop body
LE: loop exit
PB: predicated region body
PF: predicated region fallthrough
CT: control target
= control target key end

     0   :  { %11 = vsyncpa [#allocation3], 0  ;;  %vm26_vm0 = vcmask 261120   ;;  %v268_v3 = vmov 0.0|0.0   ;;  %vm269_vm1 = vmmov 0   ;;  %v270_v7 = vmov 0.0   ;;  %s360_s0 = inlined_call_operand.vmem [shape: f32[1,8,16], index: 0, kind: input, shape index: {}]   ;;  %s361_s1 = inlined_call_operand.vmem [shape: f32[8,32], index: 1, kind: input, shape index: {}]   ;;  %s362_s2 = inlined_call_operand.vmem [shape: f32[48,40], index: 2, kind: input, shape index: {}]   ;;  %s363_s3 = inlined_call_operand.vmem [shape: f32[1,40], index: 3, kind: input, shape index: {}]   ;;  %s364_s4 = inlined_call_operand.hbm [shape: f32[1,8,8], index: 4, kind: output, shape index: {0}]   ;;  %s365_s5 = inlined_call_operand.hbm [shape: f32[8,32], index: 5, kind: output, shape index: {1}]  }
   0x1   :  { %v25_v0 = vld [vmem:[%s361_s1] sm:$0xff]  ;;  %v29_v2 = vld [vmem:[%s362_s2 + $0x8] sm:$0xff]  ;;  %200 = vmatprep.subr.bf16.mxu0 %v268_v3  ;;  %v30_v5 = vld [vmem:[%s362_s2 + $0x10] sm:$0xff]  ;;  %197 = vmatprep.mubr.msk.f32.mxu0 %vm269_vm1, %v270_v7 }
   0x2   :  { %v28_v1 = vld [vmem:[%s362_s2] sm:$0xff]  ;;  %27 = vst.msk [vmem:[#allocation4] sm:$0xff] %vm26_vm0, %v25_v0  ;;  %v31_v6 = vld [vmem:[%s362_s2 + $0x18] sm:$0xff] }
   0x3   :  { %v201_v4 = vpack.c.bf16 %v29_v2, %v28_v1  ;;  %v204_v8 = vpack.c.bf16 %v31_v6, %v30_v5 }
   0x5   :  { %202 = vmatpush3.bf16.msra.mxu0 %v201_v4 }
   0x6   :  { %12 = vsyncpa [#allocation5], 0  ;;  %203 = vmatprep.subr.bf16.mxu0 %v268_v3  ;;  %v32_v9 = vld [vmem:[%s362_s2 + $0x20] sm:$0xff]  ;;  %v33_v10 = vld [vmem:[%s362_s2 + $0x28] sm:$0xff]  ;;  %s271_s6 = smov 16   ;;  %vm41_vm2 = vcmask 130048  }
   0x7   :  { %v207_v11 = vpack.c.bf16 %v33_v10, %v32_v9  ;;  %v36_v13 = vld [vmem:[%s360_s0] sm:$0xff]  ;;  %vm49_vm3 = vcmask 392192   ;;  %vm123_vm4 = vcmask 326912   ;;  %s272_s0 = smov 96   ;;  %vm134_vm5 = vcmask 64512   ;;  %s273_s2 = smov [#allocation4]  }
   0x8   :  { %v176_v16 = vld [vmem:[%s363_s3] ss:$0 sm:$0xff]  ;;  %s164_s3 = sshll.u32 %s273_s2, 4  ;;  %s165_s3 = int_to_ptr.vmem [resolvable:$true] %s164_s3 }
   0x9   :  { %205 = vmatpush3.bf16.msra.mxu0 %v204_v8  ;;  %v35_v12 = vld [vmem:[#allocation4] sm:$0xff]  ;;  %s220_s11 = scalar_lea.vmem %s165_s3, 128  ;;  %p225_p1 = scmp.lt.s32.totalorder %s165_s3, %s165_s3 }
   0xa   :  { %206 = vmatprep.subr.bf16.mxu0 %v268_v3  ;;  %38 = vrot.lane.b32.xlu0 %v35_v12, %s271_s6  ;;  %p221_p0 = scmp.ne.s32.totalorder %s165_s3, %s220_s11  ;;  %p226_p2 = scmp.lt.s32.totalorder %s220_s11, %s220_s11 }
   0xc   :  { %p227_p3 = por %p226_p2, %p225_p1 }
   0xd   :  { %208 = vmatpush3.bf16.msra.mxu0 %v207_v11 }
   0xe   :  { %p228_p4 = pnand %p227_p3, %p221_p0 }
  0x7c   :  { %v39_v14 = vpop.permute.xlu0 %38 }
  0x7d   :  { %v42_v15 = vsel %vm41_vm2, %v36_v13, %v39_v14 }
  0x7e   :  { %198 = vmatmul.mubr.msk.f32.vlgmr.msra.gmra.mrb[0].mxu0 %vm49_vm3, %v42_v15 }
 0x151   :  { %v119_v17 = vpop.f32.mrb[0].mxu0 }
 0x152   :  { %v120_v18 = vadd.f32 %v176_v16, %v119_v17  ;;  %v199_v19 = vpop.f32.mrb[1].mxu0 }
 0x154   :  { %147 = vst.msk [vmem:[#allocation4] sm:$0xff] %vm26_vm0, %v120_v18  ;;  %v124_v20 = vsel %vm123_vm4, %v120_v18, -inf }
 0x155   :  { %125 = vmax.xlane.f32.xlu0 %v124_v20 }
 0x1e2   :  { %v126_v21 = vpop.xlane.xlu0 %125 }
 0x1e3   :  { %v127_v22 = vsub.f32 %v120_v18, %v126_v21 }
 0x1e5   :  { %v128_v23 = vmul.f32 1.442695, %v127_v22 }
 0x1e7   :  { %216 = vpow2.f32 %v128_v23 }
 0x1f1   :  { %v217_v24 = vpop.eup %216 }
 0x1f2   :  { %131 = vrot.lane.b32.xlu1 %v217_v24, %s272_s0 }
 0x264   :  { %v132_v25 = vpop.permute.xlu1 %131 }
 0x265   :  { %v135_v26 = vsel %vm134_vm5, %v132_v25, 0.0 }
 0x266   :  { %136 = vadd.xlane.f32.xlu1 %v135_v26 }
 0x2f3   :  { %v137_v27 = vpop.xlane.xlu1 %136 }
 0x2f4   :  { %218 = vlog2.f32 %v137_v27 }
 0x2f5   :  { %231 = shalt.err (!%p228_p4)
}
 0x2f6   :  { %s232_s14 = scalar_lea.hbm %s365_s5, 128 }
 0x2f7   :  { %p233_p5 = scmp.ne.s32.totalorder %s365_s5, %s232_s14  ;;  %p236_p6 = scmp.lt.u32.totalorder %s232_s14, %s365_s5 }
 0x2f9   :  { %p238_p7 = pnand %p236_p6, %p233_p5 }
 0x2fb   :  { %241 = shalt.err (!%p238_p7)
}
 0x2fc   :  { %167 = dma.vmem_to_hbm [thread:$0]  %s165_s3, 128, %s365_s5, [#allocation5]  }
 0x2fd   :  { %s274_s21 = smov [#allocation2]  }
 0x2fe   :  { %v219_v28 = vpop.eup %218  ;;  %s154_s22 = sshll.u32 %s274_s21, 4  ;;  %s155_s22 = int_to_ptr.vmem [resolvable:$true] %s154_s22 }
 0x2ff   :  { %v139_v29 = vmul.f32 0.6931472, %v219_v28  ;;  %s242_s23 = scalar_lea.vmem %s155_s22, 128  ;;  %p247_p9 = scmp.lt.s32.totalorder %s155_s22, %s155_s22 }
 0x300   :  { %p243_p8 = scmp.ne.s32.totalorder %s155_s22, %s242_s23  ;;  %p248_p10 = scmp.lt.s32.totalorder %s242_s23, %s242_s23 }
 0x301   :  { %v140_v30 = vsub.f32 %v127_v22, %v139_v29 }
 0x302   :  { %p249_p11 = por %p248_p10, %p247_p9 }
 0x303   :  { %142 = vrot.lane.b32.xlu0 %v140_v30, %s272_s0 }
 0x304   :  { %p250_p12 = pnand %p249_p11, %p243_p8 }
 0x375   :  { %v143_v31 = vpop.permute.xlu0 %142 }
 0x376   :  { %145 = vst.msk [vmem:[#allocation2] sm:$0xff] %vm134_vm5, %v143_v31 }
 0x377   :  { %253 = shalt.err (!%p250_p12)
}
 0x378   :  { %s254_s5 = scalar_lea.hbm %s364_s4, 128 }
 0x379   :  { %p255_p13 = scmp.ne.s32.totalorder %s364_s4, %s254_s5  ;;  %p258_p0 = scmp.lt.u32.totalorder %s254_s5, %s364_s4 }
 0x37b   :  { %p260_p1 = pnand %p258_p0, %p255_p13 }
 0x37d   :  { %263 = shalt.err (!%p260_p1)
}
 0x37e   :  { %157 = dma.vmem_to_hbm [thread:$0]  %s155_s22, 128, %s364_s4, [#allocation3]  }
 0x37f   :  { %264 = dma.done.wait [#allocation3], 128  }
 0x380   :  { %265 = vsyncadd [#allocation3], 4294967168 }
 0x381   :  { %266 = dma.done.wait [#allocation5], 128  }
 0x382   :  { %267 = vsyncadd [#allocation5], 4294967168 }
 0x383   :  { %174 = vsyncpa [#allocation3], 1 }
 0x384   :  { %175 = vsyncpa [#allocation5], 1 }

</bundles_post_ra>
